<compile_context>
chip_gen: v6e
topology: v6e:2x2x1
jax: 0.10.0
libtpu: 0.0.40
codegen_flags: <defaults>
</compile_context>

<pallas_src>
import functools

import jax
import jax.numpy as jnp
from jax import lax
from jax.experimental import pallas as pl
from jax.experimental.pallas import tpu as pltpu


# ----------------------------- kernel helpers ------------------------------

def _softplus(x):
    # numerically stable log(1 + exp(x)), matching torch.nn.Softplus
    return jnp.maximum(x, 0.0) + jnp.log1p(jnp.exp(-jnp.abs(x)))


def _fast_recip(x):
    # EUP vrcp (approx, its own bundle slot) + one Newton step -> full f32
    # accuracy so the 1e-4 reference comparison still passes.
    r = pl.reciprocal(x, approx=True)
    return r * (2.0 - x * r)


def _round_up(n, m):
    return ((n + m - 1) // m) * m


def _choose_tb(batch, batch_block):
    # lane-dense (transposed) output wants TB to be a multiple of 128
    tb = _round_up(min(batch_block, batch), 128)
    # keep >= 2 grid steps when the batch allows it so v7x's two TensorCores
    # can both take tiles of the "parallel" axis
    if batch >= 2 * 128:
        tb = min(tb, _round_up(pl.cdiv(batch, 2), 128))
    return max(tb, 128)


# ------------------------------- the kernel --------------------------------

def _i2m2_uldd_kernel(x_ref, w_enc_ref, b_enc_ref, w_head_t_ref, b_head_t_ref,
                      out_ref, *, num_classes):
    C = num_classes

    # One fused encoder matmul for all four experts: (TB, D) @ (D, 4H).
    # x / w_enc may be bf16; accumulation is f32.  Dropout(0.3) is identity in
    # eval mode; ReLU applied once on the fused 128-lane block.
    h = jnp.dot(x_ref[...], w_enc_ref[...],
                preferred_element_type=jnp.float32) + b_enc_ref[...]
    h = jnp.maximum(h, 0.0)

    # Block-diagonal head matmul emitted TRANSPOSED (A @ B^T MXU pattern):
    #   heads_t[n, b] = sum_h w_head_t[n, h] * h[b, h]      -> (4C+4, TB)
    # so the tiny feature dim lands on sublanes and the batch dim on the 128
    # lanes.  Everything downstream is lane-dense and the final store is an
    # unmasked full-width vst.
    heads_t = lax.dot_general(
        w_head_t_ref[...], h,
        dimension_numbers=(((1,), (1,)), ((), ())),
        preferred_element_type=jnp.float32) + b_head_t_ref[...]

    mu_t = heads_t[:4 * C, :]                    # (4C, TB) four mean heads
    v_pre = heads_t[4 * C:, :]                   # (4,  TB) four var heads (pre-softplus)

    v = jnp.maximum(_softplus(v_pre), 1e-6)
    logv = jnp.log(v)
    t = _fast_recip(v)                           # == exp(-logv)

    # inverse-variance (precision) fusion, all (.., TB) lane-dense
    num = (mu_t[0 * C:1 * C, :] * t[0:1, :]
           + mu_t[1 * C:2 * C, :] * t[1:2, :]
           + mu_t[2 * C:3 * C, :] * t[2:3, :]
           + mu_t[3 * C:4 * C, :] * t[3:4, :])
    den = t[0:1, :] + t[1:2, :] + t[2:3, :] + t[3:4, :] + 1e-8
    fused_t = num * _fast_recip(den)

    # (C+4, TB) lane-dense output slab: rows [0,C) fused logits, rows [C,C+4)
    # per-expert log-variances.  Sublane concat of lane-dense tiles is cheap.
    out_ref[...] = jnp.concatenate([fused_t, logv], axis=0)


# ------------------------------ python glue --------------------------------

def _init_linear(key, in_dim, out_dim):
    kw, kb = jax.random.split(key)
    bound = 1.0 / jnp.sqrt(jnp.float32(in_dim))
    w = jax.random.uniform(kw, (in_dim, out_dim), jnp.float32, -bound, bound)
    b = jax.random.uniform(kb, (1, out_dim), jnp.float32, -bound, bound)
    return w, b


def _init_expert(key, in_dim, hid_dim, num_classes):
    k1, k2, k3 = jax.random.split(key, 3)
    w_enc, b_enc = _init_linear(k1, in_dim, hid_dim)
    w_mu, b_mu = _init_linear(k2, hid_dim, num_classes)
    w_v, b_v = _init_linear(k3, hid_dim, 1)
    return dict(w_enc=w_enc, b_enc=b_enc, w_mu=w_mu, b_mu=b_mu,
                w_v=w_v, b_v=b_v)


def init_params(key, bio_dim, fau_dim, fl_dim, hid_dim, latent_dim, num_classes):
    kb, kf, kl, ki = jax.random.split(key, 4)
    # latent_dim / CVAE parameters are not needed on the eval forward path.
    return dict(
        bio=_init_expert(kb, bio_dim, hid_dim, num_classes),
        fau=_init_expert(kf, fau_dim, hid_dim, num_classes),
        fl=_init_expert(kl, fl_dim, hid_dim, num_classes),
        inter=_init_expert(ki, bio_dim + fau_dim + fl_dim, hid_dim, num_classes),
    )


def pack_params(params, indices, in_dim, compute_dtype=jnp.bfloat16):
    """One-time packing of the 4 experts into two fused weight matrices.

    The per-modality gathers x[:, indices[...]] are folded into the encoder
    weight by scattering each expert's rows at its column indices, so the
    kernel only ever reads x once.  The head weights are stored transposed so
    the kernel can emit the head matmul in (features, batch) layout.
    """
    names = ("bio", "fau", "fl", "inter")
    H = params["bio"]["w_enc"].shape[1]
    C = params["bio"]["w_mu"].shape[1]

    w_enc = jnp.zeros((in_dim, 4 * H), jnp.float32)
    w_enc = w_enc.at[indices["bio"], 0 * H:1 * H].set(params["bio"]["w_enc"])
    w_enc = w_enc.at[indices["fau"], 1 * H:2 * H].set(params["fau"]["w_enc"])
    w_enc = w_enc.at[indices["fl"], 2 * H:3 * H].set(params["fl"]["w_enc"])
    w_enc = w_enc.at[:, 3 * H:4 * H].set(params["inter"]["w_enc"])
    b_enc = jnp.concatenate([params[n]["b_enc"] for n in names], axis=1)

    NH = 4 * C + 4
    w_head = jnp.zeros((4 * H, NH), jnp.float32)
    for e, n in enumerate(names):
        w_head = w_head.at[e * H:(e + 1) * H, e * C:(e + 1) * C].set(
            params[n]["w_mu"])
        w_head = w_head.at[e * H:(e + 1) * H, 4 * C + e].set(
            params[n]["w_v"][:, 0])
    b_head = jnp.concatenate(
        [params[n]["b_mu"] for n in names] + [params[n]["b_v"] for n in names],
        axis=1)

    return dict(
        w_enc=w_enc.astype(compute_dtype),   # bf16 halves x/w_enc HBM bytes
        b_enc=b_enc,                         # f32, added post f32 accumulation
        w_head_t=w_head.T,                   # (NH, 4H) f32
        b_head_t=b_head.T,                   # (NH, 1)  f32
    )


def i2m2_uldd_forward(x, packed, *, batch_block=4096):
    B, D = x.shape
    w_enc = packed["w_enc"]
    H4 = w_enc.shape[1]
    NH = packed["w_head_t"].shape[0]
    C = (NH - 4) // 4

    # bf16 (or f32) cast at the pallas_call boundary; under jit this fuses
    # with the producer of x.
    x = x.astype(w_enc.dtype)

    TB = _choose_tb(B, batch_block)
    grid = (pl.cdiv(B, TB),)

    cost = pl.CostEstimate(
        flops=2 * B * (D * H4 + H4 * NH),
        transcendentals=16 * B,
        bytes_accessed=(B * D * x.dtype.itemsize
                        + B * (C + 4) * 4
                        + (D * H4 + H4) * w_enc.dtype.itemsize
                        + (NH * H4 + NH) * 4),
    )

    slab = pl.pallas_call(
        functools.partial(_i2m2_uldd_kernel, num_classes=C),
        grid=grid,
        out_shape=jax.ShapeDtypeStruct((C + 4, B), jnp.float32),
        in_specs=[
            pl.BlockSpec((TB, D), lambda i: (i, 0)),     # x streams by batch tile
            pl.BlockSpec((D, H4), lambda i: (0, 0)),     # weights stay VMEM-resident
            pl.BlockSpec((1, H4), lambda i: (0, 0)),
            pl.BlockSpec((NH, H4), lambda i: (0, 0)),
            pl.BlockSpec((NH, 1), lambda i: (0, 0)),
        ],
        out_specs=pl.BlockSpec((C + 4, TB), lambda i: (0, i)),
        compiler_params=pltpu.CompilerParams(
            dimension_semantics=("parallel",),
            vmem_limit_bytes=32 * 1024 * 1024,
        ),
        cost_estimate=cost,
    )(x, w_enc, packed["b_enc"], packed["w_head_t"], packed["b_head_t"])

    fused = slab[:C, :].T                        # (B, C)
    # var_reg = mean over batch of (lvb + lvf + lvl + lvi); only the B valid
    # columns exist in the slab, so padded tile columns never contribute.
    var_reg = jnp.sum(slab[C:, :]) / B

    rec_loss = jnp.float32(0.0)
    kl_loss = jnp.float32(0.0)
    return fused, rec_loss, kl_loss, var_reg


# --------------------- pure-JAX reference (correctness) --------------------

def _expert_ref(xs, p):
    h = jnp.maximum(xs @ p["w_enc"] + p["b_enc"], 0.0)
    mu = h @ p["w_mu"] + p["b_mu"]
    v = jnp.maximum(_softplus(h @ p["w_v"] + p["b_v"]), 1e-6)
    return mu, jnp.log(v)


def i2m2_uldd_reference(x, indices, params):
    mub, lvb = _expert_ref(x[:, indices["bio"]], params["bio"])
    muf, lvf = _expert_ref(x[:, indices["fau"]], params["fau"])
    mul, lvl = _expert_ref(x[:, indices["fl"]], params["fl"])
    mui, lvi = _expert_ref(x, params["inter"])
    tb, tf = jnp.exp(-lvb), jnp.exp(-lvf)
    tl, ti = jnp.exp(-lvl), jnp.exp(-lvi)
    num = mub * tb + muf * tf + mul * tl + mui * ti
    den = tb + tf + tl + ti + 1e-8
    fused = num / den
    var_reg = jnp.mean(lvb + lvf + lvl + lvi)
    return fused, jnp.float32(0.0), jnp.float32(0.0), var_reg


if __name__ == "__main__":
    # small shapes consistent with the module (hid=32 -> 4*hid = 128 lanes)
    bio_dim, fau_dim, fl_dim = 16, 16, 16
    hid_dim, latent_dim, num_classes = 32, 8, 4
    batch = 300      # chosen so the default TB selection yields a 2-tile grid
                     # with a ragged last tile

    key = jax.random.PRNGKey(0)
    kx, kp = jax.random.split(key)
    D = bio_dim + fau_dim + fl_dim
    x = jax.random.normal(kx, (batch, D), jnp.float32)
    indices = {
        "bio": jnp.arange(0, bio_dim),
        "fau": jnp.arange(bio_dim, bio_dim + fau_dim),
        "fl": jnp.arange(bio_dim + fau_dim, D),
    }

    params = init_params(kp, bio_dim, fau_dim, fl_dim, hid_dim, latent_dim,
                         num_classes)

    # f32 packing: tight-tolerance correctness path
    packed_f32 = pack_params(params, indices, D, compute_dtype=jnp.float32)
    fused32, _, _, var32 = i2m2_uldd_forward(x, packed_f32)

    # bf16 packing: the performance path (halved HBM reads, bf16 MXU)
    packed_bf16 = pack_params(params, indices, D, compute_dtype=jnp.bfloat16)
    fused16, rec_loss, kl_loss, var16 = i2m2_uldd_forward(x, packed_bf16)

    jax.block_until_ready((fused32, var32, fused16, var16, rec_loss, kl_loss))

    fused_r, _, _, var_reg_r = i2m2_uldd_reference(x, indices, params)
    assert fused32.shape == (batch, num_classes)
    assert jnp.allclose(fused32, fused_r, atol=1e-4, rtol=1e-4), "f32 fused mismatch"
    assert jnp.allclose(var32, var_reg_r, atol=1e-4, rtol=1e-4), "f32 var_reg mismatch"
    assert fused16.shape == (batch, num_classes)
    assert jnp.allclose(fused16, fused_r, atol=5e-2, rtol=5e-2), "bf16 fused mismatch"
    assert jnp.allclose(var16, var_reg_r, atol=5e-2, rtol=5e-2), "bf16 var_reg mismatch"

    print("KERNEL_OK")
</pallas_src>

<mosaic_0001>
module attributes {stable_mosaic.version = 11 : i64} {
  func.func @_i2m2_uldd_kernel(%arg0: i32, %arg1: memref<256x48xf32, #tpu.memory_space<vmem>>, %arg2: memref<48x128xf32, #tpu.memory_space<vmem>>, %arg3: memref<1x128xf32, #tpu.memory_space<vmem>>, %arg4: memref<20x128xf32, #tpu.memory_space<vmem>>, %arg5: memref<20x1xf32, #tpu.memory_space<vmem>>, %arg6: memref<8x256xf32, #tpu.memory_space<vmem>>) attributes {dimension_semantics = [#tpu.dimension_semantics<parallel>], iteration_bounds = array<i64: 2>, scalar_prefetch = 0 : i64, scratch_operands = 0 : i64, tpu.core_type = #tpu.core_type<tc>, window_params = [{transform_indices = @transform_0, window_bounds = array<i64: 256, 48>}, {pipeline_mode = #tpu.pipeline_mode<synchronous>, transform_indices = @transform_1, window_bounds = array<i64: 48, 128>}, {pipeline_mode = #tpu.pipeline_mode<synchronous>, transform_indices = @transform_2, window_bounds = array<i64: 1, 128>}, {pipeline_mode = #tpu.pipeline_mode<synchronous>, transform_indices = @transform_3, window_bounds = array<i64: 20, 128>}, {pipeline_mode = #tpu.pipeline_mode<synchronous>, transform_indices = @transform_4, window_bounds = array<i64: 20, 1>}, {transform_indices = @transform_5, window_bounds = array<i64: 8, 256>}]} {
    %c0 = arith.constant 0 : index
    %c0_0 = arith.constant 0 : index
    %0 = vector.load %arg1[%c0, %c0_0] : memref<256x48xf32, #tpu.memory_space<vmem>>, vector<256x48xf32>
    %c0_1 = arith.constant 0 : index
    %c0_2 = arith.constant 0 : index
    %1 = vector.load %arg2[%c0_1, %c0_2] : memref<48x128xf32, #tpu.memory_space<vmem>>, vector<48x128xf32>
    %cst = arith.constant dense<0.000000e+00> : vector<256x128xf32>
    %2 = tpu.matmul %0, %1, %cst {dimension_numbers = #tpu.dot_dimension_numbers<[1], [0], [0], [1], [0, 0, 1, 1], [], []>} : vector<256x48xf32>, vector<48x128xf32>, vector<256x128xf32> -> vector<256x128xf32>
    %c0_3 = arith.constant 0 : index
    %c0_4 = arith.constant 0 : index
    %3 = vector.load %arg3[%c0_3, %c0_4] : memref<1x128xf32, #tpu.memory_space<vmem>>, vector<1x128xf32>
    %4 = vector.broadcast %3 : vector<1x128xf32> to vector<256x128xf32>
    %5 = arith.addf %2, %4 : vector<256x128xf32>
    %cst_5 = arith.constant 0.000000e+00 : f32
    %6 = vector.broadcast %cst_5 : f32 to vector<256x128xf32>
    %7 = arith.maximumf %5, %6 : vector<256x128xf32>
    %c0_6 = arith.constant 0 : index
    %c0_7 = arith.constant 0 : index
    %8 = vector.load %arg4[%c0_6, %c0_7] : memref<20x128xf32, #tpu.memory_space<vmem>>, vector<20x128xf32>
    %cst_8 = arith.constant dense<0.000000e+00> : vector<20x256xf32>
    %9 = tpu.matmul %8, %7, %cst_8 {dimension_numbers = #tpu.dot_dimension_numbers<[1], [1], [0], [0], [0, 0, 1, 0], [], []>} : vector<20x128xf32>, vector<256x128xf32>, vector<20x256xf32> -> vector<20x256xf32>
    %c0_9 = arith.constant 0 : index
    %c0_10 = arith.constant 0 : index
    %10 = vector.load %arg5[%c0_9, %c0_10] : memref<20x1xf32, #tpu.memory_space<vmem>>, vector<20x1xf32>
    %11 = vector.broadcast %10 : vector<20x1xf32> to vector<20x256xf32>
    %12 = arith.addf %9, %11 : vector<20x256xf32>
    %13 = vector.extract_strided_slice %12 {offsets = [0, 0], sizes = [16, 256], strides = [1, 1]} : vector<20x256xf32> to vector<16x256xf32>
    %14 = vector.extract_strided_slice %12 {offsets = [16, 0], sizes = [4, 256], strides = [1, 1]} : vector<20x256xf32> to vector<4x256xf32>
    %cst_11 = arith.constant 0.000000e+00 : f32
    %15 = vector.broadcast %cst_11 : f32 to vector<4x256xf32>
    %16 = arith.maximumf %14, %15 : vector<4x256xf32>
    %17 = math.absf %14 : vector<4x256xf32>
    %cst_12 = arith.constant 0.000000e+00 : f32
    %18 = vector.broadcast %cst_12 : f32 to vector<4x256xf32>
    %19 = arith.subf %18, %17 : vector<4x256xf32>
    %20 = math.exp %19 : vector<4x256xf32>
    %21 = math.log1p %20 : vector<4x256xf32>
    %22 = arith.addf %16, %21 : vector<4x256xf32>
    %cst_13 = arith.constant 9.99999997E-7 : f32
    %23 = vector.broadcast %cst_13 : f32 to vector<4x256xf32>
    %24 = arith.maximumf %22, %23 : vector<4x256xf32>
    %25 = math.log %24 : vector<4x256xf32>
    %26 = tpu.reciprocal %24 {approx = true} : vector<4x256xf32> -> vector<4x256xf32>
    %27 = arith.mulf %24, %26 : vector<4x256xf32>
    %cst_14 = arith.constant 2.000000e+00 : f32
    %28 = vector.broadcast %cst_14 : f32 to vector<4x256xf32>
    %29 = arith.subf %28, %27 : vector<4x256xf32>
    %30 = arith.mulf %26, %29 : vector<4x256xf32>
    %31 = vector.extract_strided_slice %13 {offsets = [0, 0], sizes = [4, 256], strides = [1, 1]} : vector<16x256xf32> to vector<4x256xf32>
    %32 = vector.extract_strided_slice %30 {offsets = [0, 0], sizes = [1, 256], strides = [1, 1]} : vector<4x256xf32> to vector<1x256xf32>
    %33 = vector.broadcast %32 : vector<1x256xf32> to vector<4x256xf32>
    %34 = arith.mulf %31, %33 : vector<4x256xf32>
    %35 = vector.extract_strided_slice %13 {offsets = [4, 0], sizes = [4, 256], strides = [1, 1]} : vector<16x256xf32> to vector<4x256xf32>
    %36 = vector.extract_strided_slice %30 {offsets = [1, 0], sizes = [1, 256], strides = [1, 1]} : vector<4x256xf32> to vector<1x256xf32>
    %37 = vector.broadcast %36 : vector<1x256xf32> to vector<4x256xf32>
    %38 = arith.mulf %35, %37 : vector<4x256xf32>
    %39 = arith.addf %34, %38 : vector<4x256xf32>
    %40 = vector.extract_strided_slice %13 {offsets = [8, 0], sizes = [4, 256], strides = [1, 1]} : vector<16x256xf32> to vector<4x256xf32>
    %41 = vector.extract_strided_slice %30 {offsets = [2, 0], sizes = [1, 256], strides = [1, 1]} : vector<4x256xf32> to vector<1x256xf32>
    %42 = vector.broadcast %41 : vector<1x256xf32> to vector<4x256xf32>
    %43 = arith.mulf %40, %42 : vector<4x256xf32>
    %44 = arith.addf %39, %43 : vector<4x256xf32>
    %45 = vector.extract_strided_slice %13 {offsets = [12, 0], sizes = [4, 256], strides = [1, 1]} : vector<16x256xf32> to vector<4x256xf32>
    %46 = vector.extract_strided_slice %30 {offsets = [3, 0], sizes = [1, 256], strides = [1, 1]} : vector<4x256xf32> to vector<1x256xf32>
    %47 = vector.broadcast %46 : vector<1x256xf32> to vector<4x256xf32>
    %48 = arith.mulf %45, %47 : vector<4x256xf32>
    %49 = arith.addf %44, %48 : vector<4x256xf32>
    %50 = vector.extract_strided_slice %30 {offsets = [0, 0], sizes = [1, 256], strides = [1, 1]} : vector<4x256xf32> to vector<1x256xf32>
    %51 = vector.extract_strided_slice %30 {offsets = [1, 0], sizes = [1, 256], strides = [1, 1]} : vector<4x256xf32> to vector<1x256xf32>
    %52 = arith.addf %50, %51 : vector<1x256xf32>
    %53 = vector.extract_strided_slice %30 {offsets = [2, 0], sizes = [1, 256], strides = [1, 1]} : vector<4x256xf32> to vector<1x256xf32>
    %54 = arith.addf %52, %53 : vector<1x256xf32>
    %55 = vector.extract_strided_slice %30 {offsets = [3, 0], sizes = [1, 256], strides = [1, 1]} : vector<4x256xf32> to vector<1x256xf32>
    %56 = arith.addf %54, %55 : vector<1x256xf32>
    %cst_15 = arith.constant 9.99999993E-9 : f32
    %57 = vector.broadcast %cst_15 : f32 to vector<1x256xf32>
    %58 = arith.addf %56, %57 : vector<1x256xf32>
    %59 = tpu.reciprocal %58 {approx = true} : vector<1x256xf32> -> vector<1x256xf32>
    %60 = arith.mulf %58, %59 : vector<1x256xf32>
    %cst_16 = arith.constant 2.000000e+00 : f32
    %61 = vector.broadcast %cst_16 : f32 to vector<1x256xf32>
    %62 = arith.subf %61, %60 : vector<1x256xf32>
    %63 = arith.mulf %59, %62 : vector<1x256xf32>
    %64 = vector.broadcast %63 : vector<1x256xf32> to vector<4x256xf32>
    %65 = arith.mulf %49, %64 : vector<4x256xf32>
    %66 = tpu.concatenate %65, %25 in 0 : vector<4x256xf32>, vector<4x256xf32> -> vector<8x256xf32>
    %c0_17 = arith.constant 0 : index
    %c0_18 = arith.constant 0 : index
    %67 = vector.load %arg6[%c0_17, %c0_18] : memref<8x256xf32, #tpu.memory_space<vmem>>, vector<8x256xf32>
    tpu.vector_store %arg6[%c0_17, %c0_18], %66 {strides = array<i32>} : memref<8x256xf32, #tpu.memory_space<vmem>>, vector<8x256xf32>,
    return
  }
  func.func @transform_0(%arg0: i32) -> (i32, i32) {
    %c0_i32 = arith.constant 0 : i32
    %c0_i32_0 = arith.constant 0 : i32
    return %arg0, %c0_i32 : i32, i32
  }
  func.func @transform_1(%arg0: i32) -> (i32, i32) {
    %c0_i32 = arith.constant 0 : i32
    %c0_i32_0 = arith.constant 0 : i32
    %c0_i32_1 = arith.constant 0 : i32
    return %c0_i32, %c0_i32_0 : i32, i32
  }
  func.func @transform_2(%arg0: i32) -> (i32, i32) {
    %c0_i32 = arith.constant 0 : i32
    %c0_i32_0 = arith.constant 0 : i32
    %c0_i32_1 = arith.constant 0 : i32
    return %c0_i32, %c0_i32_0 : i32, i32
  }
  func.func @transform_3(%arg0: i32) -> (i32, i32) {
    %c0_i32 = arith.constant 0 : i32
    %c0_i32_0 = arith.constant 0 : i32
    %c0_i32_1 = arith.constant 0 : i32
    return %c0_i32, %c0_i32_0 : i32, i32
  }
  func.func @transform_4(%arg0: i32) -> (i32, i32) {
    %c0_i32 = arith.constant 0 : i32
    %c0_i32_0 = arith.constant 0 : i32
    %c0_i32_1 = arith.constant 0 : i32
    return %c0_i32, %c0_i32_0 : i32, i32
  }
  func.func @transform_5(%arg0: i32) -> (i32, i32) {
    %c0_i32 = arith.constant 0 : i32
    %c0_i32_0 = arith.constant 0 : i32
    return %c0_i32, %arg0 : i32, i32
  }
}

</mosaic_0001>

<bundles_post_ra>
// kernel: tpu_custom_call.1
= control target key start
LH: loop header
LB: loop body
LE: loop exit
PB: predicated region body
PF: predicated region fallthrough
CT: control target
= control target key end

     0   :  { %10 = vsyncpa [#allocation3], 0  ;;  %s1644_s0 = inlined_call_operand.vmem [shape: f32[300,48], index: 0, kind: input, shape index: {}]   ;;  %s1645_s1 = inlined_call_operand.vmem [shape: f32[48,128], index: 1, kind: input, shape index: {}]   ;;  %s1646_s2 = inlined_call_operand.vmem [shape: f32[1,128], index: 2, kind: input, shape index: {}]   ;;  %s1647_s3 = inlined_call_operand.vmem [shape: f32[20,128], index: 3, kind: input, shape index: {}]   ;;  %s1648_s4 = inlined_call_operand.vmem [shape: f32[20,1], index: 4, kind: input, shape index: {}]   ;;  %s1649_s5 = inlined_call_operand.hbm [shape: f32[8,300], index: 5, kind: output, shape index: {}]  }
   0x1   :  { %12 = vsyncpa [#allocation3 + $0x1], 0  ;;  %s1327_s18 = smov 0   ;;  %s1329_s19 = smov 0  }
   0x2   :  { %s1331_s20 = smov 0   ;;  %s1333_s21 = smov 0  }
   0x3 LB: > { %s1348_s22 = sadd.s32 4294967295, %s1293_s21   ;;  %s986_s23 = sadd.s32 4294967294, %s1293_s21   ;;  %s1293_s21 = sphi %s1333_s21, %s1655_s21   ;;  %s1289_s20 = sphi %s1331_s20, %s1654_s20   ;;  %s1285_s19 = sphi %s1329_s19, %s1653_s19   ;;  %s1281_s18 = sphi %s1327_s18, %s1652_s18  }
   0x4   : > { %s1352_s24 = sadd.s32 1, %s1293_s21   ;;  %s135_s25 = sadd.s32 1, %s1289_s20 }
   0x5   : > { %s132_s26 = ssub.s32 %s1293_s21, %s1352_s24  ;;  %p145_p0 = scmp.ne.s32.totalorder %s1289_s20, %s1285_s19 }
   0x6   : > { %p133_p1 = scmp.eq.s32.totalorder %s132_s26, 0  ;;  %p146_p2 = scmp.eq.s32.totalorder %s1348_s22, 1 }
   0x7   : > { %p151_p3 = scmp.ne.s32.totalorder %s1285_s19, %s1281_s18  ;;  %p152_p4 = scmp.eq.s32.totalorder %s986_s23, 1 }
   0x8   : > { %s1363_s27 = scalar_select %p133_p1, %s1289_s20, %s135_s25  }
   0x9   : > { %p1365_p5 = por %p146_p2, %p145_p0  ;;  %p1369_p6 = por %p152_p4, %p151_p3 }
   0xa   : > { %p989_p7 = scmp.ge.s32.totalorder %s1293_s21, 1  ;;  %p199_p8 = scmp.lt.s32.totalorder %s1293_s21, 3 }
   0xc   : > { %p200_p9 = pnand %p989_p7, %p199_p8 }
   0xd   : > { %s991_s9 = sshll.u32 (!%p200_p9), %s1348_s22, 5  ;;  %s228_s26 = sand.u32 (!%p200_p9), 1, %s1285_s19  }
   0xe   : > { %203 = sbr.rel (%p200_p9) target bundleno = 684 (0x2ac), region = 40  ;;  %p236_p10 = scmp.lt.s32.totalorder (!%p200_p9), %s991_s9, 37 }
   0xf   : > { %s990_s30 = sshll.u32 (!%p200_p9), %s228_s26, 4  ;;  %s1597_s7 = scalar_lea.sflag (!%p200_p9), [#allocation3], %s228_s26 }
  0x10   : > { %s230_s6 = scalar_lea.vmem (!%p200_p9), [#allocation2], %s990_s30 }
  0x13   : > { %v287_v0 = vld [vmem:[%s1645_s1 + $0x28] sm:$0xff]  ;;  %v286_v1 = vld [vmem:[%s1645_s1 + $0x20] sm:$0xff]  ;;  %v285_v2 = vld [vmem:[%s1645_s1 + $0x18] sm:$0xff]  ;;  %s1657_s9 = smov (!%p236_p10, %s991_s9), 37  ;;  %vm295_vm0 = vcmask 392192   ;;  %v1295_v47 = vmov 0  }
  0x14   : > { %1112 = vmatprep.subr.mxu0 %v287_v0  ;;  %v284_v3 = vld [vmem:[%s1645_s1 + $0x10] sm:$0xff]  ;;  %s992_s14 = sshll.u32 %s1657_s9, 3  ;;  %v283_v4 = vld [vmem:[%s1645_s1 + $0x8] sm:$0xff]  ;;  %v282_v6 = vld [vmem:[%s1645_s1] sm:$0xff]  ;;  %1211 = vset.pattern.permute.xlu0 %v1295_v47  ;;  %vm901_vm3 = vcmask 1043456   ;;  %s1027_s8 = sshll.u32 (%p1365_p5), %s1348_s22, 1 }
  0x15   : > { %1113 = vmatpush3.msra.mxu0 %v287_v0  ;;  %s1394_s25 = scalar_lea.vmem %s1644_s0, %s992_s14  ;;  %v1466_v38 = vld [vmem:[%s1647_s3] sm:$0xff]  ;;  %v654_v44 = vld [vmem:[%s1648_s4 + $0x10] sm:$0xf]  ;;  %v653_v45 = vld [vmem:[%s1648_s4 + $0x8] sm:$0xff]  ;;  %1212 = vset.pattern.permute.xlu1 %v1295_v47  ;;  %s915_s9 = ssub.s32 (%p1365_p5), 3, %s1027_s8 }
  0x16   : > { %1114 = vmatprep.subr.mxu0 %v286_v1  ;;  %v250_v5 = vld [vmem:[%s1394_s25] sm:$0xff]  ;;  %v251_v7 = vld [vmem:[%s1394_s25 + $0x8] sm:$0xff]  ;;  %v252_v8 = vld [vmem:[%s1394_s25 + $0x10] sm:$0xff]  ;;  %1106 = vmatprep.mubr.f32.mxu1 %v1466_v38  ;;  %p916_p11 = scmp.lt.s32.totalorder (%p1365_p5), %s915_s9, 2 }
  0x17   : > { %1115 = vmatpush3.msra.mxu0 %v286_v1  ;;  %1124 = vmatprep.mubr.msk.f32.mxu0 %vm295_vm0, %v250_v5  ;;  %v253_v9 = vld [vmem:[%s1394_s25 + $0x18] sm:$0xff]  ;;  %v254_v10 = vld [vmem:[%s1394_s25 + $0x20] sm:$0xff]  ;;  %v255_v11 = vld [vmem:[%s1394_s25 + $0x28] sm:$0xff] }
  0x18   : > { %1116 = vmatprep.subr.mxu0 %v285_v2  ;;  %v256_v12 = vld [vmem:[%s1394_s25 + $0x30] sm:$0xff]  ;;  %v257_v13 = vld [vmem:[%s1394_s25 + $0x38] sm:$0xff]  ;;  %v258_v14 = vld [vmem:[%s1394_s25 + $0x40] sm:$0xff]  ;;  %667 = vperm.xlu0 %1211, %v654_v44  }
  0x19   : > { %1117 = vmatpush3.msra.mxu0 %v285_v2  ;;  %v259_v15 = vld [vmem:[%s1394_s25 + $0x48] sm:$0xff]  ;;  %v260_v16 = vld [vmem:[%s1394_s25 + $0x50] sm:$0xff]  ;;  %v261_v17 = vld [vmem:[%s1394_s25 + $0x58] sm:$0xff]  ;;  %662 = vperm.xlu1 %1212, %v653_v45  }
  0x1a   : > { %1118 = vmatprep.subr.mxu0 %v284_v3  ;;  %v262_v18 = vld [vmem:[%s1394_s25 + $0x60] sm:$0xff]  ;;  %v263_v19 = vld [vmem:[%s1394_s25 + $0x68] sm:$0xff]  ;;  %v264_v20 = vld [vmem:[%s1394_s25 + $0x70] sm:$0xff] }
  0x1b   : > { %1119 = vmatpush3.msra.mxu0 %v284_v3  ;;  %v265_v21 = vld [vmem:[%s1394_s25 + $0x78] sm:$0xff]  ;;  %v266_v22 = vld [vmem:[%s1394_s25 + $0x80] sm:$0xff]  ;;  %v267_v23 = vld [vmem:[%s1394_s25 + $0x88] sm:$0xff] }
  0x1c   : > { %1120 = vmatprep.subr.mxu0 %v283_v4  ;;  %v268_v24 = vld [vmem:[%s1394_s25 + $0x90] sm:$0xff]  ;;  %v269_v25 = vld [vmem:[%s1394_s25 + $0x98] sm:$0xff]  ;;  %v270_v26 = vld [vmem:[%s1394_s25 + $0xa0] sm:$0xff] }
  0x1d   : > { %1121 = vmatpush3.msra.mxu0 %v283_v4  ;;  %v271_v27 = vld [vmem:[%s1394_s25 + $0xa8] sm:$0xff]  ;;  %v272_v28 = vld [vmem:[%s1394_s25 + $0xb0] sm:$0xff]  ;;  %v273_v29 = vld [vmem:[%s1394_s25 + $0xb8] sm:$0xff] }
  0x1e   : > { %1122 = vmatprep.subr.mxu0 %v282_v6  ;;  %v274_v30 = vld [vmem:[%s1394_s25 + $0xc0] sm:$0xff]  ;;  %v275_v31 = vld [vmem:[%s1394_s25 + $0xc8] sm:$0xff]  ;;  %v276_v32 = vld [vmem:[%s1394_s25 + $0xd0] sm:$0xff] }
  0x1f   : > { %1123 = vmatpush3.msra.mxu0 %v282_v6  ;;  %v277_v33 = vld [vmem:[%s1394_s25 + $0xd8] sm:$0xff]  ;;  %v278_v34 = vld [vmem:[%s1394_s25 + $0xe0] sm:$0xff]  ;;  %v279_v35 = vld [vmem:[%s1394_s25 + $0xe8] sm:$0xff] }
  0x20   : > { %1125 = vmatmul.mubr.msk.f32.vlgmr.msra.gmra.mxu0 %vm295_vm0, %v251_v7  ;;  %v280_v36 = vld [vmem:[%s1394_s25 + $0xf0] sm:$0xff]  ;;  %v281_v37 = vld [vmem:[%s1394_s25 + $0xf8] sm:$0xff]  ;;  %v652_v49 = vld [vmem:[%s1648_s4] sm:$0xff] }
  0x21   : > { %1127 = vmatprep.mubr.msk.f32.mxu0 %vm295_vm0, %v252_v8  ;;  %657 = vperm.xlu0 %1211, %v652_v49  }
  0x24   : > { %1128 = vmatmul.mubr.msk.f32.gmra.mxu0 %vm295_vm0, %v253_v9  ;;  %v1511_v9 = vld [vmem:[%s1646_s2] ss:$0 sm:$0xff] }
  0x25   : > { %1130 = vmatprep.mubr.msk.f32.mxu0 %vm295_vm0, %v254_v10 }
  0x28   : > { %1131 = vmatmul.mubr.msk.f32.gmra.mxu0 %vm295_vm0, %v255_v11 }
  0x29   : > { %1133 = vmatprep.mubr.msk.f32.mxu0 %vm295_vm0, %v256_v12 }
  0x2c   : > { %1134 = vmatmul.mubr.msk.f32.gmra.mxu0 %vm295_vm0, %v257_v13 }
  0x2d   : > { %1136 = vmatprep.mubr.msk.f32.mxu0 %vm295_vm0, %v258_v14 }
  0x30   : > { %1137 = vmatmul.mubr.msk.f32.gmra.mxu0 %vm295_vm0, %v259_v15 }
  0x31   : > { %1139 = vmatprep.mubr.msk.f32.mxu0 %vm295_vm0, %v260_v16 }
  0x34   : > { %1140 = vmatmul.mubr.msk.f32.gmra.mxu0 %vm295_vm0, %v261_v17 }
  0x35   : > { %1142 = vmatprep.mubr.msk.f32.mxu0 %vm295_vm0, %v262_v18 }
  0x38   : > { %1143 = vmatmul.mubr.msk.f32.gmra.mxu0 %vm295_vm0, %v263_v19 }
  0x39   : > { %1145 = vmatprep.mubr.msk.f32.mxu0 %vm295_vm0, %v264_v20 }
  0x3c   : > { %1146 = vmatmul.mubr.msk.f32.gmra.mxu0 %vm295_vm0, %v265_v21 }
  0x3d   : > { %1148 = vmatprep.mubr.msk.f32.mxu0 %vm295_vm0, %v266_v22 }
  0x40   : > { %1149 = vmatmul.mubr.msk.f32.gmra.mxu0 %vm295_vm0, %v267_v23 }
  0x41   : > { %1151 = vmatprep.mubr.msk.f32.mxu0 %vm295_vm0, %v268_v24 }
  0x44   : > { %1152 = vmatmul.mubr.msk.f32.gmra.mxu0 %vm295_vm0, %v269_v25 }
  0x45   : > { %1154 = vmatprep.mubr.msk.f32.mxu0 %vm295_vm0, %v270_v26 }
  0x48   : > { %1155 = vmatmul.mubr.msk.f32.gmra.mxu0 %vm295_vm0, %v271_v27 }
  0x49   : > { %1157 = vmatprep.mubr.msk.f32.mxu0 %vm295_vm0, %v272_v28 }
  0x4c   : > { %1158 = vmatmul.mubr.msk.f32.gmra.mxu0 %vm295_vm0, %v273_v29 }
  0x4d   : > { %1160 = vmatprep.mubr.msk.f32.mxu0 %vm295_vm0, %v274_v30 }
  0x50   : > { %1161 = vmatmul.mubr.msk.f32.gmra.mxu0 %vm295_vm0, %v275_v31 }
  0x51   : > { %1163 = vmatprep.mubr.msk.f32.mxu0 %vm295_vm0, %v276_v32 }
  0x54   : > { %1164 = vmatmul.mubr.msk.f32.gmra.mxu0 %vm295_vm0, %v277_v33 }
  0x55   : > { %1166 = vmatprep.mubr.msk.f32.mxu0 %vm295_vm0, %v278_v34 }
  0x58   : > { %1167 = vmatmul.mubr.msk.f32.gmra.mxu0 %vm295_vm0, %v279_v35 }
  0x59   : > { %1169 = vmatprep.mubr.msk.f32.mxu0 %vm295_vm0, %v280_v36 }
  0x5c   : > { %1170 = vmatmul.mubr.msk.f32.gmra.mxu0 %vm295_vm0, %v281_v37 }
  0xe0   : > { %v1469_v39 = vpop.f32.mrf.mxu0 }
  0xe2   : > { %v1471_v40 = vpop.f32.mrf.mxu0 }
  0xe4   : > { %v1473_v41 = vpop.f32.mrf.mxu0 }
  0xe6   : > { %v1475_v42 = vpop.f32.mrf.mxu0 }
  0xe8   : > { %v1477_v43 = vpop.f32.mrf.mxu0 }
  0xea   : > { %v1485_v46 = vpop.f32.mrf.mxu0 }
  0xec   : > { %v1487_v48 = vpop.f32.mrf.mxu0 }
  0xee   : > { %v1492_v50 = vpop.f32.mrf.mxu0 }
  0xf0   : > { %v1138_v51 = vpop.f32.mrf.mxu0 }
  0xf1   : > { %v504_v36 = vadd.f32 %v1138_v51, %v1511_v9 }
  0xf2   : > { %v1494_v52 = vpop.f32.mrf.mxu0 }
  0xf3   : > { %v626_v47 = vmax.f32 %v504_v36, 0.0  ;;  %v499_v49 = vadd.f32 %v1511_v9, %v1494_v52 }
  0xf4   : > { %v1141_v53 = vpop.f32.mrf.mxu0 }
  0xf5   : > { %v514_v28 = vadd.f32 %v1141_v53, %v1511_v9 }
  0xf6   : > { %v508_v54 = vpop.f32.mrf.mxu0 }
  0xf7   : > { %v628_v32 = vmax.f32 %v514_v28, 0.0  ;;  %v509_v33 = vadd.f32 %v1511_v9, %v508_v54 }
  0xf8   : > { %v1144_v55 = vpop.f32.mrf.mxu0 }
  0xf9   : > { %v524_v20 = vadd.f32 %v1144_v55, %v1511_v9  ;;  %v627_v37 = vmax.f32 %v509_v33, 0.0  ;;  %v494_v55 = vadd.f32 %v1487_v48, %v1511_v9 }
  0xfa   : > { %v518_v56 = vpop.f32.mrf.mxu0 }
  0xfb   : > { %v630_v24 = vmax.f32 %v524_v20, 0.0  ;;  %v519_v25 = vadd.f32 %v1511_v9, %v518_v56  ;;  %v625_v56 = vmax.f32 %v499_v49, 0.0 }
  0xfc   : > { %v1147_v57 = vpop.f32.mrf.mxu0 }
  0xfd   : > { %v534_v10 = vadd.f32 %v1147_v57, %v1511_v9  ;;  %v629_v29 = vmax.f32 %v519_v25, 0.0 }
  0xfe   : > { %v528_v58 = vpop.f32.mrf.mxu0 }
  0xff   : > { %v632_v16 = vmax.f32 %v534_v10, 0.0  ;;  %v529_v17 = vadd.f32 %v1511_v9, %v528_v58  ;;  %v624_v58 = vmax.f32 %v494_v55, 0.0 }
 0x100   : > { %v1496_v59 = vpop.f32.mrf.mxu0 }
 0x101   : > { %v631_v21 = vmax.f32 %v529_v17, 0.0 }
 0x102   : > { %v1498_v60 = vpop.f32.mrf.mxu0 }
 0x104   : > { %v1500_v61 = vpop.f32.mrf.mxu0 }
 0x106   : > { %v1502_v62 = vpop.f32.mrf.mxu0 }
 0x108   : > { %v1504_v63 = vpop.f32.mrf.mxu0 }
 0x109   : > { %v564_v52 = vadd.f32 %v1504_v63, %v1511_v9  ;;  %v554_v63 = vadd.f32 %v1500_v61, %v1511_v9  ;;  %v544_v61 = vadd.f32 %v1496_v59, %v1511_v9 }
 0x10a   : > { %v1506_v0 = vpop.f32.mrf.mxu0 }
 0x10b   : > { %v636_v10 = vmax.f32 %v554_v63, 0.0 }
 0x10c   : > { %v1159_v1 = vpop.f32.mrf.mxu0 }
 0x10d   : > { %v574_v53 = vadd.f32 %v1159_v1, %v1511_v9 }
 0x10e   : > { %v568_v2 = vpop.f32.mrf.mxu0 }
 0x10f   : > { %v640_v51 = vmax.f32 %v574_v53, 0.0  ;;  %v569_v57 = vadd.f32 %v1511_v9, %v568_v2  ;;  %v559_v2 = vadd.f32 %v1511_v9, %v1506_v0  ;;  %v549_v0 = vadd.f32 %v1511_v9, %v1502_v62 }
 0x110   : > { %v1162_v3 = vpop.f32.mrf.mxu0  ;;  %v539_v62 = vadd.f32 %v1511_v9, %v1498_v60  ;;  %v651_v60 = vld [vmem:[%s1647_s3 + $0x10] sm:$0xf] }
 0x111   : > { %v584_v34 = vadd.f32 %v1162_v3, %v1511_v9  ;;  %v489_v3 = vadd.f32 %v1511_v9, %v1492_v50  ;;  %v639_v1 = vmax.f32 %v569_v57, 0.0  ;;  %v479_v50 = vadd.f32 %v1511_v9, %v1485_v46 }
 0x112   : > { %v578_v4 = vpop.f32.mrf.mxu0  ;;  %v469_v46 = vadd.f32 %v1511_v9, %v1475_v42  ;;  %v459_v42 = vadd.f32 %v1511_v9, %v1471_v40 }
 0x113   : > { %v642_v44 = vmax.f32 %v584_v34, 0.0  ;;  %v579_v45 = vadd.f32 %v1511_v9, %v578_v4  ;;  %v484_v4 = vadd.f32 %v1477_v43, %v1511_v9  ;;  %v623_v48 = vmax.f32 %v489_v3, 0.0 }
 0x114   : > { %v1165_v5 = vpop.f32.mrf.mxu0  ;;  %v474_v43 = vadd.f32 %v1473_v41, %v1511_v9  ;;  %v464_v41 = vadd.f32 %v1469_v39, %v1511_v9  ;;  %v617_v59 = vmax.f32 %v459_v42, 0.0  ;;  %v650_v39 = vld [vmem:[%s1647_s3 + $0x8] sm:$0xff] }
 0x115   : > { %v594_v26 = vadd.f32 %v1165_v5, %v1511_v9  ;;  %v641_v54 = vmax.f32 %v579_v45, 0.0  ;;  %v638_v5 = vmax.f32 %v564_v52, 0.0 }
 0x116   : > { %v588_v6 = vpop.f32.mrf.mxu0 }
 0x117   : > { %v644_v30 = vmax.f32 %v594_v26, 0.0  ;;  %v589_v31 = vadd.f32 %v1511_v9, %v588_v6  ;;  %v622_v6 = vmax.f32 %v484_v4, 0.0 }
 0x118   : > { %v1168_v7 = vpop.f32.mrf.mxu0 }
 0x119   : > { %v604_v18 = vadd.f32 %v1168_v7, %v1511_v9  ;;  %v643_v35 = vmax.f32 %v589_v31, 0.0  ;;  %v637_v7 = vmax.f32 %v559_v2, 0.0 }
 0x11a   : > { %v598_v8 = vpop.f32.mrf.mxu0 }
 0x11b   : > { %v646_v22 = vmax.f32 %v604_v18, 0.0  ;;  %v599_v23 = vadd.f32 %v1511_v9, %v598_v8  ;;  %v621_v8 = vmax.f32 %v479_v50, 0.0 }
 0x11c   : > { %v1171_v11 = vpop.f32.mrf.mxu0 }
 0x11d   : > { %v614_v12 = vadd.f32 %v1171_v11, %v1511_v9  ;;  %v645_v27 = vmax.f32 %v599_v23, 0.0  ;;  %v620_v11 = vmax.f32 %v474_v43, 0.0 }
 0x11e   : > { %v608_v13 = vpop.f32.mrf.mxu0 }
 0x11f   : > { %v609_v14 = vadd.f32 %v1511_v9, %v608_v13  ;;  %v648_v15 = vmax.f32 %v614_v12, 0.0  ;;  %v635_v12 = vmax.f32 %v549_v0, 0.0  ;;  %v619_v13 = vmax.f32 %v469_v46, 0.0 }
 0x121   : > { %v647_v19 = vmax.f32 %v609_v14, 0.0  ;;  %1074 = vmatprep.subr.mxu1 %v648_v15  ;;  %v634_v14 = vmax.f32 %v544_v61, 0.0  ;;  %v618_v15 = vmax.f32 %v464_v41, 0.0 }
 0x122   : > { %1075 = vmatpush3.xpose.msra.mxu1 %v632_v16  ;;  %v633_v16 = vmax.f32 %v539_v62, 0.0 }
 0x123   : > { %1076 = vmatprep.subr.mxu1 %v647_v19  ;;  %v668_v19 = vpop.permute.xlu0 %667 }
 0x126   : > { %1077 = vmatpush3.xpose.msra.mxu1 %v631_v21 }
 0x127   : > { %1078 = vmatprep.subr.mxu1 %v646_v22  ;;  %v658_v0 = vpop.permute.xlu0 %657 }
 0x12a   : > { %1079 = vmatpush3.xpose.msra.mxu1 %v630_v24 }
 0x12b   : > { %1080 = vmatprep.subr.mxu1 %v645_v27 }
 0x12e   : > { %1081 = vmatpush3.xpose.msra.mxu1 %v629_v29 }
 0x12f   : > { %1082 = vmatprep.subr.mxu1 %v644_v30 }
 0x132   : > { %1083 = vmatpush3.xpose.msra.mxu1 %v628_v32 }
 0x133   : > { %1084 = vmatprep.subr.mxu1 %v643_v35 }
 0x136   : > { %1085 = vmatpush3.xpose.msra.mxu1 %v627_v37 }
 0x137   : > { %1086 = vmatprep.subr.mxu1 %v642_v44 }
 0x13a   : > { %1087 = vmatpush3.xpose.msra.mxu1 %v626_v47 }
 0x13b   : > { %1088 = vmatprep.subr.mxu1 %v641_v54 }
 0x13e   : > { %1089 = vmatpush3.xpose.msra.mxu1 %v625_v56 }
 0x13f   : > { %1090 = vmatprep.subr.mxu1 %v640_v51 }
 0x142   : > { %1091 = vmatpush3.xpose.msra.mxu1 %v624_v58 }
 0x143   : > { %1092 = vmatprep.subr.mxu1 %v639_v1 }
 0x146   : > { %1093 = vmatpush3.xpose.msra.mxu1 %v623_v48  ;;  %v797_v48 = vlaneseq }
 0x147   : > { %1094 = vmatprep.subr.mxu1 %v638_v5 }
 0x148   : > { %v798_v5 = vshrl.u32 %v797_v48, 7 }
 0x14a   : > { %1095 = vmatpush3.xpose.msra.mxu1 %v622_v6  ;;  %v1581_v63 = vsub.s32 0, %v798_v5  ;;  %v809_v43 = vsub.s32 1, %v798_v5  ;;  %v827_v61 = vsub.s32 2, %v798_v5 }
 0x14b   : > { %1096 = vmatprep.subr.mxu1 %v637_v7 }
 0x14e   : > { %1097 = vmatpush3.xpose.msra.mxu1 %v621_v8  ;;  %v839_v8 = vsub.s32 3, %v798_v5 }
 0x14f   : > { %1098 = vmatprep.subr.mxu1 %v636_v10 }
 0x152   : > { %1099 = vmatpush3.xpose.msra.mxu1 %v620_v11  ;;  %v663_v11 = vpop.permute.xlu1 %662 }
 0x153   : > { %1100 = vmatprep.subr.mxu1 %v635_v12 }
 0x156   : > { %1101 = vmatpush3.xpose.msra.mxu1 %v619_v13 }
 0x157   : > { %1102 = vmatprep.subr.mxu1 %v634_v14 }
 0x15a   : > { %1103 = vmatpush3.xpose.msra.mxu1 %v618_v15 }
 0x15b   : > { %1104 = vmatprep.subr.mxu1 %v633_v16 }
 0x15e   : > { %1105 = vmatpush3.xpose.msra.mxu1 %v617_v59 }
 0x161   : > { %1107 = vmatmul.mubr.f32.vlgmr.msra.gmra.mxu1 %v1466_v38 }
 0x162   : > { %1108 = vmatprep.mubr.f32.mxu1 %v650_v39 }
 0x165   : > { %1109 = vmatmul.mubr.f32.gmra.mxu1 %v650_v39 }
 0x166   : > { %1110 = vmatprep.mubr.f32.mxu1 %v651_v60 }
 0x169   : > { %1111 = vmatmul.mubr.f32.gmra.mxu1 %v651_v60 }
 0x221   : > { %v736_v40 = vpop.f32.mrf.mxu1 }
 0x222   : > { %v737_v41 = vadd.f32 %v736_v40, %v658_v0 }
 0x223   : > { %v1568_v9 = vpop.f32.mrf.mxu1 }
 0x224   : > { %v739_v15 = vadd.f32 %v1568_v9, %v658_v0 }
 0x225   : > { %v1570_v17 = vpop.f32.mrf.mxu1 }
 0x226   : > { %v743_v42 = vadd.f32 %v1570_v17, %v663_v11 }
 0x227   : > { %v1572_v18 = vpop.f32.mrf.mxu1 }
 0x228   : > { %v745_v39 = vadd.f32 %v1572_v18, %v663_v11 }
 0x229   : > { %v748_v20 = vpop.f32.mrf.mxu1 }
 0x22a   : > { %v749_v21 = vadd.f32 %v748_v20, %v668_v19 }
 0x22b   : > { %v750_v38 = vpop.f32.mrf.mxu1 }
 0x22c   : > { %v755_v22 = vand.u32 2147483647, %v749_v21  ;;  %v751_v23 = vadd.f32 %v750_v38, %v668_v19  ;;  %v753_v54 = vmax.f32 %v749_v21, 0.0 }
 0x22e   : > { %v757_v24 = vsub.f32 0.0, %v755_v22  ;;  %v756_v25 = vand.u32 2147483647, %v751_v23  ;;  %v754_v58 = vmax.f32 %v751_v23, 0.0 }
 0x230   : > { %v759_v26 = vmul.f32 1.442695, %v757_v24  ;;  %v758_v27 = vsub.f32 0.0, %v756_v25 }
 0x232   : > { %1213 = vpow2.f32 %v759_v26  ;;  %v761_v28 = vmul.f32 1.442695, %v758_v27 }
 0x234   : > { %1215 = vpow2.f32 %v761_v28 }
 0x23f   : > { %v1214_v29 = vpop.eup %1213 }
 0x240   : > { %v763_v30 = vadd.f32 1.0, %v1214_v29  ;;  %v766_v33 = vmul.f32 -0.5, %v1214_v29  ;;  %v769_v36 = vand.u32 2147483647, %v1214_v29 }
 0x241   : > { %v1216_v31 = vpop.eup %1215 }
 0x242   : > { %1217 = vlog2.f32 %v763_v30  ;;  %v772_v32 = vadd.f32 1.0, %v1216_v31  ;;  %v775_v34 = vmul.f32 -0.5, %v1216_v31  ;;  %v767_v35 = vadd.f32 1.0, %v766_v33 }
 0x243   : > { %v778_v45 = vand.u32 2147483647, %v1216_v31  ;;  %vm770_vm1 = vcmp.lt.f32.partialorder %v769_v36, 0.0004427343 }
 0x244   : > { %1219 = vlog2.f32 %v772_v32  ;;  %v776_v37 = vadd.f32 1.0, %v775_v34  ;;  %v768_v49 = vmul.f32 %v1214_v29, %v767_v35 }
 0x245   : > { %vm779_vm2 = vcmp.lt.f32.partialorder %v778_v45, 0.0004427343 }
 0x246   : > { %v777_v51 = vmul.f32 %v1216_v31, %v776_v37 }
 0x24f   : > { %v1218_v44 = vpop.eup %1217 }
 0x250   : > { %v765_v47 = vmul.f32 0.6931472, %v1218_v44 }
 0x251   : > { %v1220_v53 = vpop.eup %1219 }
 0x252   : > { %v771_v55 = vsel %vm770_vm1, %v768_v49, %v765_v47  ;;  %v774_v56 = vmul.f32 0.6931472, %v1220_v53 }
 0x253   : > { %v781_v57 = vadd.f32 %v771_v55, %v753_v54 }
 0x254   : > { %v780_v3 = vsel %vm779_vm2, %v777_v51, %v774_v56 }
 0x255   : > { %v1574_v52 = vmax.f32 %v781_v57, 1e-06  ;;  %v782_v1 = vadd.f32 %v780_v3, %v754_v58 }
 0x257   : > { %v1576_v4 = vmax.f32 %v782_v1, 1e-06  ;;  %1221 = vrcp.f32 %v1574_v52 }
 0x259   : > { %1223 = vrcp.f32 %v1576_v4 }
 0x264   : > { %v1222_v2 = vpop.eup %1221 }
 0x265   : > { %v791_v6 = vmul.f32 %v1222_v2, %v1574_v52 }
 0x266   : > { %v1224_v50 = vpop.eup %1223 }
 0x267   : > { %v793_v7 = vsub.f32 2.0, %v791_v6  ;;  %v792_v10 = vmul.f32 %v1224_v50, %v1576_v4 }
 0x269   : > { %v795_v46 = vmul.f32 %v1222_v2, %v793_v7  ;;  %v794_v12 = vsub.f32 2.0, %v792_v10 }
 0x26b   : > { %v800_v13 = vrot.slane %v795_v46, %v1581_v63  ;;  %v810_v14 = vrot.slane %v795_v46, %v809_v43  ;;  %v840_v62 = vrot.slane %v795_v46, %v839_v8  ;;  %v857_v16 = vrot.slane %v795_v46, 1 }
 0x26c   : > { %v796_v59 = vmul.f32 %v1224_v50, %v794_v12  ;;  %v828_v19 = vrot.slane %v795_v46, %v827_v61  ;;  %v863_v20 = vrot.slane %v795_v46, 2  ;;  %v869_v9 = vrot.slane %v795_v46, 3 }
 0x26d   : > { %v815_v60 = vmul.f32 %v810_v14, %v737_v41  ;;  %v805_v21 = vmul.f32 %v800_v13, %v737_v41  ;;  %v861_v38 = vadd.f32 %v857_v16, %v795_v46  ;;  %v845_v24 = vmul.f32 %v840_v62, %v743_v42 }
 0x26e   : > { %v804_v22 = vrot.slane %v796_v59, %v1581_v63  ;;  %v814_v40 = vrot.slane %v796_v59, %v809_v43  ;;  %v844_v25 = vrot.slane %v796_v59, %v839_v8  ;;  %v858_v26 = vrot.slane %v796_v59, 1 }
 0x26f   : > { %v819_v23 = vrot.slane %v815_v60, 4  ;;  %v867_v27 = vadd.f32 %v863_v20, %v861_v38  ;;  %v832_v17 = vrot.slane %v796_v59, %v827_v61  ;;  %v833_v30 = vmul.f32 %v828_v19, %v743_v42 }
 0x270   : > { %v816_v28 = vmul.f32 %v814_v40, %v739_v15  ;;  %v862_v31 = vadd.f32 %v858_v26, %v796_v59  ;;  %v864_v18 = vrot.slane %v796_v59, 2  ;;  %v806_v33 = vmul.f32 %v804_v22, %v739_v15 }
 0x271   : > { %v823_v29 = vadd.f32 %v819_v23, %v805_v21  ;;  %v873_v32 = vadd.f32 %v869_v9, %v867_v27  ;;  %v846_v35 = vmul.f32 %v844_v25, %v745_v39  ;;  %v849_v37 = vrot.slane %v845_v24, 4 }
 0x272   : > { %v820_v34 = vrot.slane %v816_v28, 4  ;;  %v868_v44 = vadd.f32 %v864_v18, %v862_v31  ;;  %v870_v45 = vrot.slane %v796_v59, 3  ;;  %v834_v53 = vmul.f32 %v832_v17, %v745_v39 }
 0x273   : > { %v835_v36 = vadd.f32 %v833_v30, %v823_v29  ;;  %v875_v47 = vadd.f32 1e-08, %v873_v32  ;;  %v850_v51 = vrot.slane %v846_v35, 4 }
 0x274   : > { %v824_v49 = vadd.f32 %v820_v34, %v806_v33  ;;  %v874_v55 = vadd.f32 %v870_v45, %v868_v44 }
 0x275   : > { %v853_v54 = vadd.f32 %v849_v37, %v835_v36  ;;  %1225 = vrcp.f32 %v875_v47 }
 0x276   : > { %v836_v56 = vadd.f32 %v834_v53, %v824_v49  ;;  %v876_v57 = vadd.f32 1e-08, %v874_v55  ;;  %1227 = vlog2.f32 %v1574_v52 }
 0x278   : > { %v854_v58 = vadd.f32 %v850_v51, %v836_v56  ;;  %1229 = vrcp.f32 %v876_v57 }
 0x279   : > { %1231 = vlog2.f32 %v1576_v4 }
 0x282   : > { %v1226_v3 = vpop.eup %1225 }
 0x283   : > { %v879_v1 = vmul.f32 %v1226_v3, %v875_v47  ;;  %v1228_v48 = vpop.eup %1227 }
 0x284   : > { %v786_v7 = vmul.f32 0.6931472, %v1228_v48 }
 0x285   : > { %v1230_v5 = vpop.eup %1229  ;;  %v881_v2 = vsub.f32 2.0, %v879_v1 }
 0x286   : > { %v880_v6 = vmul.f32 %v1230_v5, %v876_v57  ;;  %v1232_v50 = vpop.eup %1231  ;;  %v897_v4 = vrot.slane %v786_v7, 4 }
 0x287   : > { %v883_v43 = vmul.f32 %v1226_v3, %v881_v2  ;;  %v788_v52 = vmul.f32 0.6931472, %v1232_v50 }
 0x288   : > { %v882_v8 = vsub.f32 2.0, %v880_v6 }
 0x289   : > { %v888_v10 = vrot.slane %v883_v43, %v1581_v63  ;;  %v898_v41 = vrot.slane %v788_v52, 4 }
 0x28a   : > { %v884_v0 = vmul.f32 %v1230_v5, %v882_v8 }
 0x28b   : > { %v893_v11 = vmul.f32 %v888_v10, %v853_v54 }
 0x28c   : > { %v892_v46 = vrot.slane %v884_v0, %v1581_v63 }
 0x28d   : > { %v902_v61 = vsel %vm901_vm3, %v893_v11, %v897_v4  ;;  %913 = sbr.rel (!%p1365_p5) target bundleno = 684 (0x2ac), region = 44 }
 0x28e   : > { %904 = vst [vmem:[%s230_s6] sm:$0xff] %v902_v61  ;;  %v894_v12 = vmul.f32 %v892_v46, %v854_v58 }
 0x290   : > { %v903_v13 = vsel %vm901_vm3, %v894_v12, %v898_v41 }
 0x291   : > { %905 = vst [vmem:[%s230_s6 + $0x8] sm:$0xff] %v903_v13 }
 0x292   : > { %s1659_s9 = smov (!%p916_p11, %s915_s9), 2 }
 0x293   : > { %s1602_s10 = sshll.u32 %s1659_s9, 7 }
 0x294   : > { %s920_s11 = ssub.s32 256, %s1602_s10 }
 0x295   : > { %921 = vsyncadd %s1597_s7, %s920_s11  ;;  %p1029_p12 = scmp.ne.s32.totalorder %s1602_s10, 0  ;;  %s1035_s12 = sshll.u32 %s1348_s22, 8 }
 0x296   : > { %s924_s14 = scalar_lea.hbm %s1649_s5, %s1035_s12  ;;  %s927_s15 = sshll.u32 %s230_s6, 4  ;;  %s928_s15 = int_to_ptr.vmem [resolvable:$true] %s927_s15 }
 0x297   : > { %s1233_s16 = scalar_lea.vmem %s928_s15, %s1602_s10  ;;  %s1296_s17 = smov [#allocation2]  }
 0x298   : > { %p1234_p13 = scmp.ne.s32.totalorder %s928_s15, %s1233_s16  ;;  %s1237_s23 = sshll.u32 %s1296_s17, 4  ;;  %s1238_s23 = int_to_ptr.vmem [resolvable:$false] %s1237_s23 }
 0x299   : > { %s1239_s25 = scalar_lea.vmem %s1238_s23, 512  ;;  %p1240_p2 = scmp.lt.s32.totalorder %s928_s15, %s1238_s23 }
 0x29a   : > { %p1235_p0 = pnand %p1234_p13, %p1029_p12  ;;  %p1241_p3 = scmp.lt.s32.totalorder %s1239_s25, %s1233_s16 }
 0x29c   : > { %p1236_p1 = pneg %p1235_p0  ;;  %p1242_p4 = por %p1241_p3, %p1240_p2 }
 0x29e   : > { %p1243_p5 = pnand %p1242_p4, %p1236_p1 }
 0x2a0   : > { %1246 = shalt.err (!%p1243_p5)
}
 0x2a1   : > { %s1247_s22 = scalar_lea.hbm %s924_s14, %s1602_s10  ;;  %s1251_s6 = scalar_lea.hbm %s1649_s5, 384 }
 0x2a2   : > { %p1248_p7 = scmp.ne.s32.totalorder %s924_s14, %s1247_s22  ;;  %p1252_p10 = scmp.lt.s32.totalorder %s924_s14, %s1649_s5 }
 0x2a3   : > { %p1253_p11 = scmp.lt.s32.totalorder %s1251_s6, %s1247_s22 }
 0x2a4   : > { %p1249_p8 = pnand %p1248_p7, %p1029_p12 }
 0x2a5   : > { %p1254_p13 = por %p1253_p11, %p1252_p10 }
 0x2a6   : > { %p1250_p9 = pneg %p1249_p8 }
 0x2a8   : > { %p1255_p0 = pnand %p1254_p13, %p1250_p9 }
 0x2aa   : > { %1258 = shalt.err (!%p1255_p0)
}
 0x2ab   : > { %930 = dma.vmem_to_hbm [thread:$0]  (%p1029_p12), %s928_s15, %s1602_s10, %s924_s14, %s1597_s7  }
 0x2ac PF: > { %p1177_p1 = scmp.ge.s32.totalorder %s1293_s21, 2  ;;  %s939_s11 = sand.u32 1, %s1281_s18  }
 0x2ad   : > { %s940_s12 = scalar_lea.sflag [#allocation3], %s939_s11 }
 0x2ae   : > { %p1174_p2 = pnand %p1177_p1, %p1369_p6 }
 0x2b0   : > { %p1175_p3 = pneg %p1174_p2 }
 0x2b2   : > { %1276 = dma.done.wait (%p1175_p3), %s940_s12, 256  }
 0x2b3   : > { %1278 = vsyncadd (%p1175_p3), %s940_s12, 4294967040  ;;  %p15_p4 = scmp.ge.s32.totalorder %s1352_s24, 4   ;;  %s1652_s18 = smov %s1285_s19 }
 0x2b4   : > { %s1653_s19 = smov %s1289_s20  ;;  %s1654_s20 = smov %s1363_s27 }
 0x2b5   : > { %s1655_s21 = smov %s1352_s24  ;;  %17 = sbr.rel (!%p15_p4) target bundleno = 3 (0x3), region = 75 }
 0x2ba   :  { %945 = vsyncpa [#allocation3], 1 }
 0x2bb   :  { %947 = vsyncpa [#allocation3 + $0x1], 1 }

</bundles_post_ra>
